<compile_context>
chip_gen: v6e
topology: v6e:2x2x1
jax: 0.10.0
libtpu: 0.0.40
codegen_flags: <defaults>
</compile_context>

<pallas_src>
import jax
import jax.numpy as jnp
from jax.experimental import pallas as pl
from jax.experimental.pallas import tpu as pltpu

_MAX_DMA_STREAMS = 4                 # leading-dim DMA streams for large copies
_MIN_BYTES_PER_STREAM = 1 << 20      # don't split copies smaller than ~1 MiB/stream


def _split_rows(rows: int, n: int):
    """n contiguous (start, size) chunks covering [0, rows); static Python ints."""
    base, rem = divmod(rows, n)
    chunks, start = [], 0
    for i in range(n):
        size = base + (1 if i < rem else 0)
        if size:
            chunks.append((start, size))
            start += size
    return tuple(chunks)


def _make_identity_kernel(chunks):
    """Identity body: one async HBM->HBM DMA per leading-dim chunk."""

    def kernel(x_ref, o_ref, sems):
        if len(chunks) == 1:
            cp = pltpu.make_async_copy(x_ref, o_ref, sems.at[0])
            cp.start()
            cp.wait()
            return
        copies = []
        for i, (start, size) in enumerate(chunks):        # static slices -> static DMAs
            cp = pltpu.make_async_copy(
                x_ref.at[pl.ds(start, size)],
                o_ref.at[pl.ds(start, size)],
                sems.at[i],
            )
            cp.start()
            copies.append(cp)
        for cp in copies:                                  # start all, then wait all
            cp.wait()

    return kernel


def modified_module_forward(x: jax.Array, *, materialize_copy: bool = True) -> jax.Array:
    """Pass-through forward of the abstract ModifiedModule, via a Pallas kernel.

    With materialize_copy=False the input is returned as-is (zero HBM traffic — the
    theoretical optimum for an identity); the default keeps an explicit copy kernel
    so the data path is actually exercised on TPU.
    """
    if not materialize_copy or x.size == 0:
        return x

    orig_shape = x.shape
    if x.ndim == 0:
        x = x.reshape(1)  # DMA wants >=1 dim; trivial for a scalar

    rows = x.shape[0]
    nbytes = x.size * jnp.dtype(x.dtype).itemsize
    n_streams = max(1, min(_MAX_DMA_STREAMS, rows, nbytes // _MIN_BYTES_PER_STREAM))
    chunks = _split_rows(rows, n_streams)

    out = pl.pallas_call(
        _make_identity_kernel(chunks),
        out_shape=jax.ShapeDtypeStruct(x.shape, x.dtype),
        in_specs=[pl.BlockSpec(memory_space=pl.ANY)],      # raw HBM ref, no auto-DMA
        out_specs=pl.BlockSpec(memory_space=pl.ANY),       # write straight to HBM
        scratch_shapes=[pltpu.SemaphoreType.DMA((len(chunks),))],
    )(x)
    return out.reshape(orig_shape)


if __name__ == "__main__":
    key = jax.random.PRNGKey(0)

    # NCHW input consistent with a conv-style subclass: batch=2, channels=4, 16x16.
    x = jax.random.normal(key, (2, 4, 16, 16), dtype=jnp.float32)
    y = jax.block_until_ready(modified_module_forward(x))
    assert y.shape == x.shape and y.dtype == x.dtype
    assert bool(jnp.all(y == x))

    # Lane-misaligned shape: no reshape / pad / slice round trip needed anymore.
    x2 = jax.random.normal(jax.random.PRNGKey(0), (3, 5, 7), dtype=jnp.float32)
    y2 = jax.block_until_ready(modified_module_forward(x2))
    assert y2.shape == x2.shape and y2.dtype == x2.dtype
    assert bool(jnp.all(y2 == x2))

    # Moderately larger bf16 input exercises the multi-stream DMA path (4 x 1 MiB).
    x3 = jax.random.normal(jax.random.PRNGKey(0), (8, 256, 1024), dtype=jnp.bfloat16)
    y3 = jax.block_until_ready(modified_module_forward(x3))
    assert y3.shape == x3.shape and y3.dtype == x3.dtype
    assert bool(jnp.all(y3 == x3))

    print("KERNEL_OK")
</pallas_src>

<mosaic_0001>
module attributes {stable_mosaic.version = 11 : i64} {
  func.func @kernel(%arg0: memref<2x4x16x16xf32, #tpu.memory_space<any>>, %arg1: memref<2x4x16x16xf32, #tpu.memory_space<any>>, %arg2: memref<1x!tpu.dma_semaphore, #tpu.memory_space<semaphore_mem>>) attributes {dimension_semantics = [], scalar_prefetch = 0 : i64, scratch_operands = 1 : i64, tpu.core_type = #tpu.core_type<tc>} {
    %c0_i32 = arith.constant 0 : i32
    %0 = tpu.memref_slice %arg2[%c0_i32] : memref<1x!tpu.dma_semaphore, #tpu.memory_space<semaphore_mem>> -> memref<1x!tpu.dma_semaphore, #tpu.memory_space<semaphore_mem>>
    %1 = tpu.memref_squeeze %0 : memref<1x!tpu.dma_semaphore, #tpu.memory_space<semaphore_mem>> -> memref<!tpu.dma_semaphore, #tpu.memory_space<semaphore_mem>>
    tpu.enqueue_dma source(%arg0 : memref<2x4x16x16xf32, #tpu.memory_space<any>>) target(%arg1 : memref<2x4x16x16xf32, #tpu.memory_space<any>>) target_semaphore(%1 : memref<!tpu.dma_semaphore, #tpu.memory_space<semaphore_mem>>)
    %c0_i32_0 = arith.constant 0 : i32
    %2 = tpu.memref_slice %arg2[%c0_i32_0] : memref<1x!tpu.dma_semaphore, #tpu.memory_space<semaphore_mem>> -> memref<1x!tpu.dma_semaphore, #tpu.memory_space<semaphore_mem>>
    %3 = tpu.memref_squeeze %2 : memref<1x!tpu.dma_semaphore, #tpu.memory_space<semaphore_mem>> -> memref<!tpu.dma_semaphore, #tpu.memory_space<semaphore_mem>>
    tpu.wait_dma2 semaphore(%3 : memref<!tpu.dma_semaphore, #tpu.memory_space<semaphore_mem>>) src(%arg0 : memref<2x4x16x16xf32, #tpu.memory_space<any>>) dst(%arg1 : memref<2x4x16x16xf32, #tpu.memory_space<any>>)
    return
  }
}

</mosaic_0001>

<bundles_post_ra>
// kernel: tpu_custom_call.1
= control target key start
LH: loop header
LB: loop body
LE: loop exit
PB: predicated region body
PF: predicated region fallthrough
CT: control target
= control target key end

     0   :  { %s30_s6 = smov [#allocation2]   ;;  %s31_s7 = smov 131072   ;;  %s49_s0 = inlined_call_operand.hbm [shape: f32[2,4,16,16], index: 0, kind: input, shape index: {}]   ;;  %s50_s1 = inlined_call_operand.hbm [shape: f32[2,4,16,16], index: 1, kind: output, shape index: {}]  }
   0x1   :  { %s32_s8 = smov 0  }
   0x2   :  { %12 = dma.general %s49_s0, 2048, %s50_s1, %s30_s6, %s31_s7, [#allocation4], %s32_s8, 0  }
   0x3   :  { %28 = dma.done.wait [#allocation2], 2048 }
   0x4   :  { %29 = vsyncadd [#allocation2], 4294965248 }
   0x5   :  { %18 = vsyncmov [#allocation2] }
   0x8   :  { %s19_s13 = vpop.sfrf %18 }
   0x9   :  { %p24_p0 = scmp.ne.s32.totalorder %s19_s13, 0 }
   0xb   :  { %23 = shalt.err (%p24_p0)  }

</bundles_post_ra>
